<compile_context>
chip_gen: v6e
topology: v6e:2x2x1
jax: 0.10.0
libtpu: 0.0.40
codegen_flags: <defaults>
</compile_context>

<pallas_src>
import functools

import jax
import jax.numpy as jnp
from jax.experimental import pallas as pl
from jax.experimental.pallas import tpu as pltpu

EPS = 1e-5


def resnet_unit_kernel(x_ref, masks_ref, w1_ref, g1_ref, be1_ref,
                       w2_ref, g2_ref, be2_ref, o_ref, *, W, matmul_dtype):
    # x_ref: (Cin, M) channel-major, M = N*H*W flattened row-major as (n, y, x).
    C, M = x_ref.shape
    inv_m = jnp.float32(1.0 / M)

    x = x_ref[...]                       # (Cin, M); also the identity branch
    masks = masks_ref[...]               # (9, M) precomputed boundary masks

    offs = [(oy, ox) for oy in (-1, 0, 1) for ox in (-1, 0, 1)]

    def im2col_t(y):
        """(Cy, M) -> (9*Cy, M); row order (dy, dx, channel) matches w*_r columns.

        NOTE: the flat spatial shift assumes the lane axis flattens as (n, y, x)
        row-major.  Every position wrapped by pltpu.roll coincides with a masked
        row/column, so roll+mask is exact.  Any layout change (e.g. a grid over
        N) must preserve this per-image flattening order or re-derive the masks.
        """
        taps = []
        for i, (oy, ox) in enumerate(offs):
            s = oy * W + ox              # flat spatial shift
            if s == 0:
                taps.append(y)           # center tap: always valid
            else:
                shifted = pltpu.roll(y, (-s) % M, axis=1)   # shifted[:, m] = y[:, m+s]
                taps.append(shifted * masks[i:i + 1, :])    # zero out-of-image taps
        return jnp.concatenate(taps, axis=0).astype(matmul_dtype)

    def batchnorm(acc, g_ref, be_ref):
        """Training-mode BN (biased batch variance), single-pass stats.

        Both reductions (sum, sum of squares) are fused into one lane reduce
        over a (2C, M) concat so only one XLU reduction sits on the serial
        conv -> BN -> conv chain.
        """
        stats = jnp.sum(jnp.concatenate([acc, acc * acc], axis=0),
                        axis=1, keepdims=True) * inv_m       # (2C, 1)
        mean = stats[:C]
        var = jnp.maximum(stats[C:] - mean * mean, 0.0)       # guard E[x^2]-m^2 < 0
        scale = g_ref[...] * jax.lax.rsqrt(var + EPS)          # (C, 1)
        shift = be_ref[...] - mean * scale
        return acc * scale + shift

    # ---- conv1 as ONE K=9*Cin matmul (bias dropped: cancelled by training BN) ----
    acc1 = jnp.dot(w1_ref[...], im2col_t(x),
                   preferred_element_type=jnp.float32)         # (Cout, M) f32
    y1 = jnp.maximum(batchnorm(acc1, g1_ref, be1_ref), 0.0)

    # ---- conv2 as ONE K=9*Cout matmul ----
    acc2 = jnp.dot(w2_ref[...], im2col_t(y1),
                   preferred_element_type=jnp.float32)         # (Cout, M) f32
    y2 = batchnorm(acc2, g2_ref, be2_ref)

    # ---- residual add + relu; lane-dense store (last dim = M, multiple of 128) ----
    o_ref[...] = jnp.maximum(y2 + x, 0.0)


def _tap_masks(N, H, W):
    """Packed (9, M) validity masks for the 3x3 taps, built once on the host side."""
    M = N * H * W
    col = jnp.arange(M, dtype=jnp.int32)
    xq = col % W
    yq = (col // W) % H
    rows = []
    for oy in (-1, 0, 1):
        for ox in (-1, 0, 1):
            rows.append((yq + oy >= 0) & (yq + oy < H) &
                        (xq + ox >= 0) & (xq + ox < W))
    return jnp.stack(rows, axis=0).astype(jnp.float32)          # (9, M)


def basic_resnet_unit(x_nchw, params, *, use_bf16=False):
    """Fused BasicResNetUnit forward.  x_nchw: (N, C, H, W) float32.

    use_bf16: cast the MXU operands (weights + im2col taps) to bf16 with f32
    accumulation.  Native MXU dtype on v5e/v6e/v7x (2-4x matmul throughput at
    realistic C); loosens numerics to ~1e-2.  Off by default.
    """
    w1, b1, g1, be1, w2, b2, g2, be2 = params
    # b1 / b2 intentionally unused: a per-channel constant added before
    # TRAINING-mode BatchNorm is exactly cancelled by the batch-mean subtraction.
    del b1, b2
    N, Cin, H, W = x_nchw.shape
    Cout = w1.shape[0]
    assert Cin == Cout, "identity residual requires in_channels == out_channels"
    M = N * H * W

    matmul_dtype = jnp.bfloat16 if use_bf16 else jnp.float32

    # Channel-major flattening puts M = N*H*W in the lane dimension.
    x_cm = jnp.transpose(x_nchw.astype(jnp.float32), (1, 0, 2, 3)).reshape(Cin, M)
    masks = _tap_masks(N, H, W)                                  # (9, M)
    # OIHW -> (O, kh, kw, I) -> (O, 9*I); column order (dy, dx, channel) matches im2col_t.
    w1_r = jnp.transpose(w1, (0, 2, 3, 1)).reshape(Cout, 9 * Cin).astype(matmul_dtype)
    w2_r = jnp.transpose(w2, (0, 2, 3, 1)).reshape(Cout, 9 * Cout).astype(matmul_dtype)

    vmem = pl.BlockSpec(memory_space=pltpu.MemorySpace.VMEM)
    # TODO(synk): for realistic ResNet shapes, grid over N/H with a two-pass BN
    # (cross-step stats accumulator + pl.when finalize), keep x as (N, C, H*W) to
    # drop the wrapper-side NCHW transposes (full HBM round trips at scale),
    # accumulate the 9 taps instead of materializing the (9*C, M) im2col when
    # C >= 64, mark the batch/spatial axis "parallel" in dimension_semantics
    # (2 TCs on v7x), and re-derive the M tile per generation (v7x has 64 MiB
    # VMEM vs 128 MiB on v5e/v6e).  Unnecessary at this toy size.
    out_cm = pl.pallas_call(
        functools.partial(resnet_unit_kernel, W=W, matmul_dtype=matmul_dtype),
        out_shape=jax.ShapeDtypeStruct((Cout, M), jnp.float32),
        in_specs=[vmem] * 8,
        out_specs=vmem,
        compiler_params=pltpu.CompilerParams(vmem_limit_bytes=32 * 1024 * 1024),
    )(x_cm, masks, w1_r, g1.reshape(-1, 1), be1.reshape(-1, 1),
      w2_r, g2.reshape(-1, 1), be2.reshape(-1, 1))

    return jnp.transpose(out_cm.reshape(Cout, N, H, W), (1, 0, 2, 3))   # back to NCHW


def reference(x_nchw, params):
    """Pure-JAX reference matching PyTorch semantics (NCHW, training-mode BN)."""
    w1, b1, g1, be1, w2, b2, g2, be2 = params

    def conv(x, w, b):
        y = jax.lax.conv_general_dilated(
            x, w, window_strides=(1, 1), padding=((1, 1), (1, 1)),
            dimension_numbers=('NCHW', 'OIHW', 'NCHW'))
        return y + b.reshape(1, -1, 1, 1)

    def bn(x, g, be):
        m = jnp.mean(x, axis=(0, 2, 3), keepdims=True)
        v = jnp.mean((x - m) ** 2, axis=(0, 2, 3), keepdims=True)
        return (x - m) * jax.lax.rsqrt(v + EPS) * g.reshape(1, -1, 1, 1) \
            + be.reshape(1, -1, 1, 1)

    out = jnp.maximum(bn(conv(x_nchw, w1, b1), g1, be1), 0.0)
    out = bn(conv(out, w2, b2), g2, be2)
    return jnp.maximum(out + x_nchw, 0.0)


if __name__ == "__main__":
    # Small shapes: batch=2, in_channels=out_channels=8, spatial=16 (stride=1,
    # downsample=None so the identity residual add is valid).
    N, C, H, W = 2, 8, 16, 16

    key = jax.random.PRNGKey(0)
    keys = jax.random.split(key, 9)
    x = jax.random.normal(keys[0], (N, C, H, W), jnp.float32)

    params = (
        0.1 * jax.random.normal(keys[1], (C, C, 3, 3), jnp.float32),   # conv1.weight
        0.1 * jax.random.normal(keys[2], (C,), jnp.float32),           # conv1.bias
        1.0 + 0.1 * jax.random.normal(keys[3], (C,), jnp.float32),     # bn1.weight
        0.1 * jax.random.normal(keys[4], (C,), jnp.float32),           # bn1.bias
        0.1 * jax.random.normal(keys[5], (C, C, 3, 3), jnp.float32),   # conv2.weight
        0.1 * jax.random.normal(keys[6], (C,), jnp.float32),           # conv2.bias
        1.0 + 0.1 * jax.random.normal(keys[7], (C,), jnp.float32),     # bn2.weight
        0.1 * jax.random.normal(keys[8], (C,), jnp.float32),           # bn2.bias
    )

    out = jax.block_until_ready(basic_resnet_unit(x, params))
    ref = jax.block_until_ready(reference(x, params))

    assert out.shape == (N, C, H, W), out.shape
    assert jnp.allclose(out, ref, atol=1e-4, rtol=1e-4), \
        float(jnp.max(jnp.abs(out - ref)))
    print("KERNEL_OK")
</pallas_src>

<mosaic_0001>
module attributes {stable_mosaic.version = 11 : i64} {
  func.func @resnet_unit_kernel(%arg0: memref<8x512xf32, #tpu.memory_space<vmem>>, %arg1: memref<9x512xf32, #tpu.memory_space<vmem>>, %arg2: memref<8x72xf32, #tpu.memory_space<vmem>>, %arg3: memref<8x1xf32, #tpu.memory_space<vmem>>, %arg4: memref<8x1xf32, #tpu.memory_space<vmem>>, %arg5: memref<8x72xf32, #tpu.memory_space<vmem>>, %arg6: memref<8x1xf32, #tpu.memory_space<vmem>>, %arg7: memref<8x1xf32, #tpu.memory_space<vmem>>, %arg8: memref<8x512xf32, #tpu.memory_space<vmem>>) attributes {dimension_semantics = [], scalar_prefetch = 0 : i64, scratch_operands = 0 : i64, tpu.core_type = #tpu.core_type<tc>} {
    %c0 = arith.constant 0 : index
    %c0_0 = arith.constant 0 : index
    %0 = vector.load %arg0[%c0, %c0_0] : memref<8x512xf32, #tpu.memory_space<vmem>>, vector<8x512xf32>
    %c0_1 = arith.constant 0 : index
    %c0_2 = arith.constant 0 : index
    %1 = vector.load %arg1[%c0_1, %c0_2] : memref<9x512xf32, #tpu.memory_space<vmem>>, vector<9x512xf32>
    %c0_3 = arith.constant 0 : index
    %c0_4 = arith.constant 0 : index
    %2 = vector.load %arg2[%c0_3, %c0_4] : memref<8x72xf32, #tpu.memory_space<vmem>>, vector<8x72xf32>
    %c17_i32 = arith.constant 17 : i32
    %3 = tpu.dynamic_rotate %0 by %c17_i32 dim 1 : vector<8x512xf32>, i32 -> vector<8x512xf32>
    %4 = vector.extract_strided_slice %1 {offsets = [0, 0], sizes = [1, 512], strides = [1, 1]} : vector<9x512xf32> to vector<1x512xf32>
    %5 = vector.broadcast %4 : vector<1x512xf32> to vector<8x512xf32>
    %6 = arith.mulf %3, %5 : vector<8x512xf32>
    %c16_i32 = arith.constant 16 : i32
    %7 = tpu.dynamic_rotate %0 by %c16_i32 dim 1 : vector<8x512xf32>, i32 -> vector<8x512xf32>
    %8 = vector.extract_strided_slice %1 {offsets = [1, 0], sizes = [1, 512], strides = [1, 1]} : vector<9x512xf32> to vector<1x512xf32>
    %9 = vector.broadcast %8 : vector<1x512xf32> to vector<8x512xf32>
    %10 = arith.mulf %7, %9 : vector<8x512xf32>
    %c15_i32 = arith.constant 15 : i32
    %11 = tpu.dynamic_rotate %0 by %c15_i32 dim 1 : vector<8x512xf32>, i32 -> vector<8x512xf32>
    %12 = vector.extract_strided_slice %1 {offsets = [2, 0], sizes = [1, 512], strides = [1, 1]} : vector<9x512xf32> to vector<1x512xf32>
    %13 = vector.broadcast %12 : vector<1x512xf32> to vector<8x512xf32>
    %14 = arith.mulf %11, %13 : vector<8x512xf32>
    %c1_i32 = arith.constant 1 : i32
    %15 = tpu.dynamic_rotate %0 by %c1_i32 dim 1 : vector<8x512xf32>, i32 -> vector<8x512xf32>
    %16 = vector.extract_strided_slice %1 {offsets = [3, 0], sizes = [1, 512], strides = [1, 1]} : vector<9x512xf32> to vector<1x512xf32>
    %17 = vector.broadcast %16 : vector<1x512xf32> to vector<8x512xf32>
    %18 = arith.mulf %15, %17 : vector<8x512xf32>
    %c511_i32 = arith.constant 511 : i32
    %19 = tpu.dynamic_rotate %0 by %c511_i32 dim 1 : vector<8x512xf32>, i32 -> vector<8x512xf32>
    %20 = vector.extract_strided_slice %1 {offsets = [5, 0], sizes = [1, 512], strides = [1, 1]} : vector<9x512xf32> to vector<1x512xf32>
    %21 = vector.broadcast %20 : vector<1x512xf32> to vector<8x512xf32>
    %22 = arith.mulf %19, %21 : vector<8x512xf32>
    %c497_i32 = arith.constant 497 : i32
    %23 = tpu.dynamic_rotate %0 by %c497_i32 dim 1 : vector<8x512xf32>, i32 -> vector<8x512xf32>
    %24 = vector.extract_strided_slice %1 {offsets = [6, 0], sizes = [1, 512], strides = [1, 1]} : vector<9x512xf32> to vector<1x512xf32>
    %25 = vector.broadcast %24 : vector<1x512xf32> to vector<8x512xf32>
    %26 = arith.mulf %23, %25 : vector<8x512xf32>
    %c496_i32 = arith.constant 496 : i32
    %27 = tpu.dynamic_rotate %0 by %c496_i32 dim 1 : vector<8x512xf32>, i32 -> vector<8x512xf32>
    %28 = vector.extract_strided_slice %1 {offsets = [7, 0], sizes = [1, 512], strides = [1, 1]} : vector<9x512xf32> to vector<1x512xf32>
    %29 = vector.broadcast %28 : vector<1x512xf32> to vector<8x512xf32>
    %30 = arith.mulf %27, %29 : vector<8x512xf32>
    %c495_i32 = arith.constant 495 : i32
    %31 = tpu.dynamic_rotate %0 by %c495_i32 dim 1 : vector<8x512xf32>, i32 -> vector<8x512xf32>
    %32 = vector.extract_strided_slice %1 {offsets = [8, 0], sizes = [1, 512], strides = [1, 1]} : vector<9x512xf32> to vector<1x512xf32>
    %33 = vector.broadcast %32 : vector<1x512xf32> to vector<8x512xf32>
    %34 = arith.mulf %31, %33 : vector<8x512xf32>
    %35 = tpu.concatenate %6, %10, %14, %18, %0, %22, %26, %30, %34 in 0 : vector<8x512xf32>, vector<8x512xf32>, vector<8x512xf32>, vector<8x512xf32>, vector<8x512xf32>, vector<8x512xf32>, vector<8x512xf32>, vector<8x512xf32>, vector<8x512xf32> -> vector<72x512xf32>
    %cst = arith.constant dense<0.000000e+00> : vector<8x512xf32>
    %36 = tpu.matmul %2, %35, %cst {dimension_numbers = #tpu.dot_dimension_numbers<[1], [0], [0], [1], [0, 0, 1, 1], [], []>} : vector<8x72xf32>, vector<72x512xf32>, vector<8x512xf32> -> vector<8x512xf32>
    %37 = arith.mulf %36, %36 : vector<8x512xf32>
    %38 = tpu.concatenate %36, %37 in 0 : vector<8x512xf32>, vector<8x512xf32> -> vector<16x512xf32>
    %cst_5 = arith.constant dense<0.000000e+00> : vector<16xf32>
    %39 = vector.multi_reduction <add>, %38, %cst_5 [1] : vector<16x512xf32> to vector<16xf32>
    %40 = vector.shape_cast %39 : vector<16xf32> to vector<16x1xf32>
    %cst_6 = arith.constant 0.001953125 : f32
    %41 = vector.broadcast %cst_6 : f32 to vector<16x1xf32>
    %42 = arith.mulf %40, %41 : vector<16x1xf32>
    %43 = vector.extract_strided_slice %42 {offsets = [0, 0], sizes = [8, 1], strides = [1, 1]} : vector<16x1xf32> to vector<8x1xf32>
    %44 = vector.extract_strided_slice %42 {offsets = [8, 0], sizes = [8, 1], strides = [1, 1]} : vector<16x1xf32> to vector<8x1xf32>
    %45 = arith.mulf %43, %43 : vector<8x1xf32>
    %46 = arith.subf %44, %45 : vector<8x1xf32>
    %cst_7 = arith.constant 0.000000e+00 : f32
    %47 = vector.broadcast %cst_7 : f32 to vector<8x1xf32>
    %48 = arith.maximumf %46, %47 : vector<8x1xf32>
    %c0_8 = arith.constant 0 : index
    %c0_9 = arith.constant 0 : index
    %49 = vector.load %arg3[%c0_8, %c0_9] : memref<8x1xf32, #tpu.memory_space<vmem>>, vector<8x1xf32>
    %cst_10 = arith.constant 9.99999974E-6 : f32
    %50 = vector.broadcast %cst_10 : f32 to vector<8x1xf32>
    %51 = arith.addf %48, %50 : vector<8x1xf32>
    %52 = math.rsqrt %51 : vector<8x1xf32>
    %53 = arith.mulf %49, %52 : vector<8x1xf32>
    %c0_11 = arith.constant 0 : index
    %c0_12 = arith.constant 0 : index
    %54 = vector.load %arg4[%c0_11, %c0_12] : memref<8x1xf32, #tpu.memory_space<vmem>>, vector<8x1xf32>
    %55 = arith.mulf %43, %53 : vector<8x1xf32>
    %56 = arith.subf %54, %55 : vector<8x1xf32>
    %57 = vector.broadcast %53 : vector<8x1xf32> to vector<8x512xf32>
    %58 = arith.mulf %36, %57 : vector<8x512xf32>
    %59 = vector.broadcast %56 : vector<8x1xf32> to vector<8x512xf32>
    %60 = arith.addf %58, %59 : vector<8x512xf32>
    %cst_13 = arith.constant 0.000000e+00 : f32
    %61 = vector.broadcast %cst_13 : f32 to vector<8x512xf32>
    %62 = arith.maximumf %60, %61 : vector<8x512xf32>
    %c0_14 = arith.constant 0 : index
    %c0_15 = arith.constant 0 : index
    %63 = vector.load %arg5[%c0_14, %c0_15] : memref<8x72xf32, #tpu.memory_space<vmem>>, vector<8x72xf32>
    %c17_i32_16 = arith.constant 17 : i32
    %64 = tpu.dynamic_rotate %62 by %c17_i32_16 dim 1 : vector<8x512xf32>, i32 -> vector<8x512xf32>
    %65 = vector.extract_strided_slice %1 {offsets = [0, 0], sizes = [1, 512], strides = [1, 1]} : vector<9x512xf32> to vector<1x512xf32>
    %66 = vector.broadcast %65 : vector<1x512xf32> to vector<8x512xf32>
    %67 = arith.mulf %64, %66 : vector<8x512xf32>
    %c16_i32_17 = arith.constant 16 : i32
    %68 = tpu.dynamic_rotate %62 by %c16_i32_17 dim 1 : vector<8x512xf32>, i32 -> vector<8x512xf32>
    %69 = vector.extract_strided_slice %1 {offsets = [1, 0], sizes = [1, 512], strides = [1, 1]} : vector<9x512xf32> to vector<1x512xf32>
    %70 = vector.broadcast %69 : vector<1x512xf32> to vector<8x512xf32>
    %71 = arith.mulf %68, %70 : vector<8x512xf32>
    %c15_i32_18 = arith.constant 15 : i32
    %72 = tpu.dynamic_rotate %62 by %c15_i32_18 dim 1 : vector<8x512xf32>, i32 -> vector<8x512xf32>
    %73 = vector.extract_strided_slice %1 {offsets = [2, 0], sizes = [1, 512], strides = [1, 1]} : vector<9x512xf32> to vector<1x512xf32>
    %74 = vector.broadcast %73 : vector<1x512xf32> to vector<8x512xf32>
    %75 = arith.mulf %72, %74 : vector<8x512xf32>
    %c1_i32_19 = arith.constant 1 : i32
    %76 = tpu.dynamic_rotate %62 by %c1_i32_19 dim 1 : vector<8x512xf32>, i32 -> vector<8x512xf32>
    %77 = vector.extract_strided_slice %1 {offsets = [3, 0], sizes = [1, 512], strides = [1, 1]} : vector<9x512xf32> to vector<1x512xf32>
    %78 = vector.broadcast %77 : vector<1x512xf32> to vector<8x512xf32>
    %79 = arith.mulf %76, %78 : vector<8x512xf32>
    %c511_i32_20 = arith.constant 511 : i32
    %80 = tpu.dynamic_rotate %62 by %c511_i32_20 dim 1 : vector<8x512xf32>, i32 -> vector<8x512xf32>
    %81 = vector.extract_strided_slice %1 {offsets = [5, 0], sizes = [1, 512], strides = [1, 1]} : vector<9x512xf32> to vector<1x512xf32>
    %82 = vector.broadcast %81 : vector<1x512xf32> to vector<8x512xf32>
    %83 = arith.mulf %80, %82 : vector<8x512xf32>
    %c497_i32_21 = arith.constant 497 : i32
    %84 = tpu.dynamic_rotate %62 by %c497_i32_21 dim 1 : vector<8x512xf32>, i32 -> vector<8x512xf32>
    %85 = vector.extract_strided_slice %1 {offsets = [6, 0], sizes = [1, 512], strides = [1, 1]} : vector<9x512xf32> to vector<1x512xf32>
    %86 = vector.broadcast %85 : vector<1x512xf32> to vector<8x512xf32>
    %87 = arith.mulf %84, %86 : vector<8x512xf32>
    %c496_i32_22 = arith.constant 496 : i32
    %88 = tpu.dynamic_rotate %62 by %c496_i32_22 dim 1 : vector<8x512xf32>, i32 -> vector<8x512xf32>
    %89 = vector.extract_strided_slice %1 {offsets = [7, 0], sizes = [1, 512], strides = [1, 1]} : vector<9x512xf32> to vector<1x512xf32>
    %90 = vector.broadcast %89 : vector<1x512xf32> to vector<8x512xf32>
    %91 = arith.mulf %88, %90 : vector<8x512xf32>
    %c495_i32_23 = arith.constant 495 : i32
    %92 = tpu.dynamic_rotate %62 by %c495_i32_23 dim 1 : vector<8x512xf32>, i32 -> vector<8x512xf32>
    %93 = vector.extract_strided_slice %1 {offsets = [8, 0], sizes = [1, 512], strides = [1, 1]} : vector<9x512xf32> to vector<1x512xf32>
    %94 = vector.broadcast %93 : vector<1x512xf32> to vector<8x512xf32>
    %95 = arith.mulf %92, %94 : vector<8x512xf32>
    %96 = tpu.concatenate %67, %71, %75, %79, %62, %83, %87, %91, %95 in 0 : vector<8x512xf32>, vector<8x512xf32>, vector<8x512xf32>, vector<8x512xf32>, vector<8x512xf32>, vector<8x512xf32>, vector<8x512xf32>, vector<8x512xf32>, vector<8x512xf32> -> vector<72x512xf32>
    %cst_24 = arith.constant dense<0.000000e+00> : vector<8x512xf32>
    %97 = tpu.matmul %63, %96, %cst_24 {dimension_numbers = #tpu.dot_dimension_numbers<[1], [0], [0], [1], [0, 0, 1, 1], [], []>} : vector<8x72xf32>, vector<72x512xf32>, vector<8x512xf32> -> vector<8x512xf32>
    %98 = arith.mulf %97, %97 : vector<8x512xf32>
    %99 = tpu.concatenate %97, %98 in 0 : vector<8x512xf32>, vector<8x512xf32> -> vector<16x512xf32>
    %cst_25 = arith.constant dense<0.000000e+00> : vector<16xf32>
    %100 = vector.multi_reduction <add>, %99, %cst_25 [1] : vector<16x512xf32> to vector<16xf32>
    %101 = vector.shape_cast %100 : vector<16xf32> to vector<16x1xf32>
    %cst_26 = arith.constant 0.001953125 : f32
    %102 = vector.broadcast %cst_26 : f32 to vector<16x1xf32>
    %103 = arith.mulf %101, %102 : vector<16x1xf32>
    %104 = vector.extract_strided_slice %103 {offsets = [0, 0], sizes = [8, 1], strides = [1, 1]} : vector<16x1xf32> to vector<8x1xf32>
    %105 = vector.extract_strided_slice %103 {offsets = [8, 0], sizes = [8, 1], strides = [1, 1]} : vector<16x1xf32> to vector<8x1xf32>
    %106 = arith.mulf %104, %104 : vector<8x1xf32>
    %107 = arith.subf %105, %106 : vector<8x1xf32>
    %cst_27 = arith.constant 0.000000e+00 : f32
    %108 = vector.broadcast %cst_27 : f32 to vector<8x1xf32>
    %109 = arith.maximumf %107, %108 : vector<8x1xf32>
    %c0_28 = arith.constant 0 : index
    %c0_29 = arith.constant 0 : index
    %110 = vector.load %arg6[%c0_28, %c0_29] : memref<8x1xf32, #tpu.memory_space<vmem>>, vector<8x1xf32>
    %cst_30 = arith.constant 9.99999974E-6 : f32
    %111 = vector.broadcast %cst_30 : f32 to vector<8x1xf32>
    %112 = arith.addf %109, %111 : vector<8x1xf32>
    %113 = math.rsqrt %112 : vector<8x1xf32>
    %114 = arith.mulf %110, %113 : vector<8x1xf32>
    %c0_31 = arith.constant 0 : index
    %c0_32 = arith.constant 0 : index
    %115 = vector.load %arg7[%c0_31, %c0_32] : memref<8x1xf32, #tpu.memory_space<vmem>>, vector<8x1xf32>
    %116 = arith.mulf %104, %114 : vector<8x1xf32>
    %117 = arith.subf %115, %116 : vector<8x1xf32>
    %118 = vector.broadcast %114 : vector<8x1xf32> to vector<8x512xf32>
    %119 = arith.mulf %97, %118 : vector<8x512xf32>
    %120 = vector.broadcast %117 : vector<8x1xf32> to vector<8x512xf32>
    %121 = arith.addf %119, %120 : vector<8x512xf32>
    %122 = arith.addf %121, %0 : vector<8x512xf32>
    %cst_33 = arith.constant 0.000000e+00 : f32
    %123 = vector.broadcast %cst_33 : f32 to vector<8x512xf32>
    %124 = arith.maximumf %122, %123 : vector<8x512xf32>
    %c0_34 = arith.constant 0 : index
    %c0_35 = arith.constant 0 : index
    %125 = vector.load %arg8[%c0_34, %c0_35] : memref<8x512xf32, #tpu.memory_space<vmem>>, vector<8x512xf32>
    tpu.vector_store %arg8[%c0_34, %c0_35], %124 {strides = array<i32>} : memref<8x512xf32, #tpu.memory_space<vmem>>, vector<8x512xf32>,
    return
  }
}

</mosaic_0001>

<bundles_post_ra>
// kernel: tpu_custom_call.1
= control target key start
LH: loop header
LB: loop body
LE: loop exit
PB: predicated region body
PF: predicated region fallthrough
CT: control target
= control target key end

     0   :  { %13 = vsyncpa [#allocation3], 0  ;;  %s1541_s0 = inlined_call_operand.vmem [shape: f32[8,512], index: 0, kind: input, shape index: {}]   ;;  %s1542_s1 = inlined_call_operand.hbm [shape: f32[9,512], index: 1, kind: input, shape index: {}]   ;;  %s1543_s2 = inlined_call_operand.hbm [shape: f32[8,72], index: 2, kind: input, shape index: {}]   ;;  %s1544_s3 = inlined_call_operand.vmem [shape: f32[8,1], index: 3, kind: input, shape index: {}]   ;;  %s1545_s4 = inlined_call_operand.vmem [shape: f32[8,1], index: 4, kind: input, shape index: {}]   ;;  %s1546_s5 = inlined_call_operand.vmem [shape: f32[8,72], index: 5, kind: input, shape index: {}]   ;;  %s1547_s6 = inlined_call_operand.vmem [shape: f32[8,1], index: 6, kind: input, shape index: {}]   ;;  %s1548_s7 = inlined_call_operand.vmem [shape: f32[8,1], index: 7, kind: input, shape index: {}]   ;;  %s1549_s8 = inlined_call_operand.hbm [shape: f32[8,512], index: 8, kind: output, shape index: {}]  }
   0x1   :  { %14 = vsyncpa [#allocation6], 0 }
   0x2   :  { %15 = vsyncpa [#allocation4], 0  ;;  %s970_s27 = smov [#allocation2]  }
   0x3   :  { %s23_s28 = sshll.u32 %s970_s27, 4  ;;  %s24_s28 = int_to_ptr.vmem [resolvable:$true] %s23_s28 }
   0x4   :  { %s912_s29 = scalar_lea.vmem %s24_s28, 1024  ;;  %p917_p1 = scmp.lt.s32.totalorder %s24_s28, %s24_s28 }
   0x5   :  { %p913_p0 = scmp.ne.s32.totalorder %s24_s28, %s912_s29  ;;  %p918_p2 = scmp.lt.s32.totalorder %s912_s29, %s912_s29 }
   0x7   :  { %p919_p3 = por %p918_p2, %p917_p1 }
   0x9   :  { %p920_p4 = pnand %p919_p3, %p913_p0 }
   0xb   :  { %923 = shalt.err (!%p920_p4)
}
   0xc   :  { %s971_s30 = smov 512   ;;  %s972_s9 = smov 32  }
   0xd   :  { %29 = dma.hbm_to_vmem [thread:$0]  %s1542_s1, 1024, %s24_s28, [#allocation3], %s971_s30, %s971_s30, %s972_s9  }
   0xe   :  { %s973_s12 = smov [#allocation5]  }
   0xf   :  { %s36_s13 = sshll.u32 %s973_s12, 4  ;;  %s37_s13 = int_to_ptr.vmem [resolvable:$true] %s36_s13 }
  0x10   :  { %s932_s14 = scalar_lea.vmem %s37_s13, 128  ;;  %p937_p6 = scmp.lt.s32.totalorder %s37_s13, %s37_s13 }
  0x11   :  { %p933_p5 = scmp.ne.s32.totalorder %s37_s13, %s932_s14  ;;  %p938_p7 = scmp.lt.s32.totalorder %s932_s14, %s932_s14 }
  0x13   :  { %p939_p8 = por %p938_p7, %p937_p6 }
  0x15   :  { %p940_p9 = pnand %p939_p8, %p933_p5 }
  0x17   :  { %943 = shalt.err (!%p940_p9)
}
  0x18   :  { %39 = dma.hbm_to_vmem [thread:$0]  %s1543_s2, 128, %s37_s13, [#allocation6]  }
  0x19   :  { %964 = dma.done.wait [#allocation3], 1024  }
  0x1a   :  { %965 = vsyncadd [#allocation3], 4294966272 }
  0x1b   :  { %966 = dma.done.wait [#allocation6], 128  }
  0x1c   :  { %967 = vsyncadd [#allocation6], 4294967168  ;;  %v1039_v0 = vld [vmem:[%s1541_s0 + $0x8] sm:$0xff]  ;;  %v1044_v1 = vld [vmem:[%s1541_s0] sm:$0xff]  ;;  %s974_s20 = smov 111   ;;  %s975_s22 = smov 112   ;;  %v77_v5 = vlaneseq }
  0x1d   :  { %304 = vrot.lane.b32.xlu0 %v1039_v0, %s974_s20  ;;  %302 = vrot.lane.b32.xlu1 %v1044_v1, %s974_s20  ;;  %v1053_v2 = vld [vmem:[%s1541_s0 + $0x10] sm:$0xff]  ;;  %s976_s23 = smov 113   ;;  %v1070_v3 = vld [vmem:[%s1541_s0 + $0x18] sm:$0xff]  ;;  %s977_s26 = smov 127   ;;  %v981_v4 = vmov 0.0   ;;  %v1130_v12 = vld [vmem:[#allocation2 + $0x8] sm:$0xff] }
  0x1e   :  { %s978_s0 = smov 1   ;;  %s979_s27 = smov 15   ;;  %403 = vmatprep.mubr.f32.mxu0 %v981_v4  ;;  %474 = vmatprep.mubr.f32.mxu1 %v981_v4  ;;  %v1122_v6 = vand.u32 127, %v77_v5  ;;  %v1124_v7 = vshrl.u32 %v77_v5, 7  ;;  %v1128_v11 = vld [vmem:[#allocation2 + $0x28] ss:$0 sm:$0xff] }
  0x1f   :  { %s980_s28 = smov 16   ;;  %s982_s29 = smov 17   ;;  %v1132_v13 = vld [vmem:[#allocation2] sm:$0xff]  ;;  %v1167_v37 = vld [vmem:[#allocation2 + $0x38] ss:$0 sm:$0xff]  ;;  %v1184_v48 = vld [vmem:[#allocation2 + $0x10] sm:$0xff] }
  0x20   :  { %vm310_vm0 = vcmp.lt.s32.totalorder %v1122_v6, 111  ;;  %v284_v10 = vsub.s32 7, %v1124_v7  ;;  %v1136_v17 = vld [vmem:[#allocation2 + $0x20] ss:$0 sm:$0xff]  ;;  %vm277_vm1 = vcmp.lt.s32.totalorder %v1122_v6, 112  ;;  %v251_v22 = vsub.s32 6, %v1124_v7 }
  0x21   :  { %306 = vrot.lane.b32.xlu0 %v1053_v2, %s974_s20  ;;  %271 = vrot.lane.b32.xlu1 %v1039_v0, %s975_s22  ;;  %vm244_vm2 = vcmp.lt.s32.totalorder %v1122_v6, 113  ;;  %v218_v36 = vsub.s32 5, %v1124_v7  ;;  %v1169_v38 = vld [vmem:[#allocation2 + $0x30] ss:$0 sm:$0xff]  ;;  %vm211_vm3 = vcmp.lt.s32.totalorder %v1122_v6, 127  ;;  %v1186_v49 = vld [vmem:[#allocation2 + $0x18] sm:$0xff] }
  0x22   :  { %v1143_v20 = vrot.slane %v1130_v12, %v284_v10  ;;  %v1146_v21 = vrot.slane %v1132_v13, %v284_v10  ;;  %v1158_v30 = vrot.slane %v1130_v12, %v251_v22  ;;  %v1164_v35 = vrot.slane %v1132_v13, %v251_v22 }
  0x23   :  { %v1181_v46 = vrot.slane %v1130_v12, %v218_v36  ;;  %v1192_v54 = vrot.slane %v1184_v48, %v284_v10  ;;  %v1195_v55 = vrot.slane %v1186_v49, %v284_v10  ;;  %v1198_v56 = vrot.slane %v1132_v13, %v218_v36 }
  0x24   :  { %v1201_v59 = vrot.slane %v1184_v48, %v251_v22  ;;  %v185_v63 = vsub.s32 3, %v1124_v7  ;;  %v1214_v10 = vrot.slane %v1186_v49, %v251_v22  ;;  %vm178_vm4 = vcmp.lt.s32.totalorder %v1122_v6, 1 }
  0x25   :  { %273 = vrot.lane.b32.xlu0 %v1053_v2, %s975_s22  ;;  %269 = vrot.lane.b32.xlu1 %v1044_v1, %s975_s22  ;;  %vm145_vm5 = vcmp.lt.s32.totalorder %v1122_v6, 15  ;;  %vm112_vm6 = vcmp.lt.s32.totalorder %v1122_v6, 16  ;;  %vm79_vm7 = vcmp.lt.s32.totalorder %v1122_v6, 17  ;;  %vm335_vm8 = vcmask 588800  }
  0x29   :  { %238 = vrot.lane.b32.xlu0 %v1039_v0, %s976_s23  ;;  %240 = vrot.lane.b32.xlu1 %v1053_v2, %s976_s23 }
  0x2d   :  { %308 = vrot.lane.b32.xlu0 %v1070_v3, %s974_s20  ;;  %236 = vrot.lane.b32.xlu1 %v1044_v1, %s976_s23 }
  0x31   :  { %205 = vrot.lane.b32.xlu0 %v1039_v0, %s977_s26  ;;  %207 = vrot.lane.b32.xlu1 %v1053_v2, %s977_s26 }
  0x35   :  { %275 = vrot.lane.b32.xlu0 %v1070_v3, %s975_s22  ;;  %203 = vrot.lane.b32.xlu1 %v1044_v1, %s977_s26 }
  0x39   :  { %242 = vrot.lane.b32.xlu0 %v1070_v3, %s976_s23  ;;  %170 = vrot.lane.b32.xlu1 %v1044_v1, %s978_s0 }
  0x3d   :  { %172 = vrot.lane.b32.xlu0 %v1039_v0, %s978_s0  ;;  %209 = vrot.lane.b32.xlu1 %v1070_v3, %s977_s26 }
  0x41   :  { %176 = vrot.lane.b32.xlu0 %v1070_v3, %s978_s0  ;;  %137 = vrot.lane.b32.xlu1 %v1044_v1, %s979_s27 }
  0x45   :  { %139 = vrot.lane.b32.xlu0 %v1039_v0, %s979_s27  ;;  %143 = vrot.lane.b32.xlu1 %v1070_v3, %s979_s27 }
  0x49   :  { %104 = vrot.lane.b32.xlu0 %v1044_v1, %s980_s28  ;;  %106 = vrot.lane.b32.xlu1 %v1039_v0, %s980_s28 }
  0x4d   :  { %174 = vrot.lane.b32.xlu0 %v1053_v2, %s978_s0  ;;  %110 = vrot.lane.b32.xlu1 %v1070_v3, %s980_s28 }
  0x51   :  { %69 = vrot.lane.b32.xlu0 %v1044_v1, %s982_s29  ;;  %71 = vrot.lane.b32.xlu1 %v1039_v0, %s982_s29 }
  0x55   :  { %141 = vrot.lane.b32.xlu0 %v1053_v2, %s979_s27  ;;  %75 = vrot.lane.b32.xlu1 %v1070_v3, %s982_s29 }
  0x59   :  { %108 = vrot.lane.b32.xlu0 %v1053_v2, %s980_s28  ;;  %73 = vrot.lane.b32.xlu1 %v1053_v2, %s982_s29 }
  0x8f   :  { %v305_v8 = vpop.permute.xlu0 %304  ;;  %v303_v9 = vpop.permute.xlu1 %302 }
  0x90   :  { %v313_v14 = vsel %vm310_vm0, %v303_v9, %v305_v8 }
  0x91   :  { %v331_v23 = vmul.f32 %v1136_v17, %v313_v14 }
  0x93   :  { %v307_v15 = vpop.permute.xlu0 %306  ;;  %v272_v16 = vpop.permute.xlu1 %271 }
  0x94   :  { %v312_v18 = vsel %vm310_vm0, %v305_v8, %v307_v15 }
  0x95   :  { %v332_v19 = vmul.f32 %v1128_v11, %v312_v18 }
  0x97   :  { %353 = vmatprep.subr.mxu0 %v332_v19  ;;  %v274_v24 = vpop.permute.xlu0 %273  ;;  %v270_v25 = vpop.permute.xlu1 %269  ;;  %v1222_v19 = vrot.slane %v1130_v12, %v185_v63 }
  0x98   :  { %v279_v26 = vsel %vm277_vm1, %v272_v16, %v274_v24  ;;  %v280_v27 = vsel %vm277_vm1, %v270_v25, %v272_v16  ;;  %354 = vmatpush1.msra.mxu0 %v331_v23 }
  0x99   :  { %v299_v28 = vmul.f32 %v1143_v20, %v279_v26  ;;  %v298_v29 = vmul.f32 %v1146_v21, %v280_v27 }
  0x9b   :  { %v239_v31 = vpop.permute.xlu0 %238  ;;  %355 = vmatprep.subr.mxu0 %v299_v28  ;;  %v241_v32 = vpop.permute.xlu1 %240 }
  0x9c   :  { %v246_v33 = vsel %vm244_vm2, %v239_v31, %v241_v32  ;;  %356 = vmatpush1.msra.mxu0 %v298_v29 }
  0x9d   :  { %v266_v34 = vmul.f32 %v1158_v30, %v246_v33 }
  0x9f   :  { %v309_v39 = vpop.permute.xlu0 %308  ;;  %357 = vmatprep.subr.mxu0 %v266_v34  ;;  %v237_v40 = vpop.permute.xlu1 %236 }
  0xa0   :  { %v311_v41 = vsel %vm310_vm0, %v307_v15, %v309_v39  ;;  %v247_v42 = vsel %vm244_vm2, %v237_v40, %v239_v31  ;;  %v314_v43 = vsel %vm310_vm0, %v309_v39, %v303_v9  ;;  %v152_v39 = vsub.s32 2, %v1124_v7 }
  0xa1   :  { %v265_v44 = vmul.f32 %v1164_v35, %v247_v42  ;;  %v334_v45 = vmul.f32 %v1167_v37, %v314_v43  ;;  %v333_v47 = vmul.f32 %v1169_v38, %v311_v41 }
  0xa3   :  { %v206_v50 = vpop.permute.xlu0 %205  ;;  %358 = vmatpush1.msra.mxu0 %v265_v44  ;;  %424 = vmatprep.subr.mxu1 %v334_v45  ;;  %v208_v51 = vpop.permute.xlu1 %207  ;;  %v1252_v44 = vrot.slane %v1130_v12, %v152_v39  ;;  %v1255_v45 = vrot.slane %v1132_v13, %v152_v39 }
  0xa4   :  { %v213_v52 = vsel %vm211_vm3, %v206_v50, %v208_v51  ;;  %425 = vmatpush1.msra.mxu1 %v333_v47  ;;  %v119_v47 = vsub.s32 1, %v1124_v7 }
  0xa5   :  { %v233_v53 = vmul.f32 %v1181_v46, %v213_v52 }
  0xa7   :  { %v276_v57 = vpop.permute.xlu0 %275  ;;  %359 = vmatprep.subr.mxu0 %v233_v53  ;;  %v204_v58 = vpop.permute.xlu1 %203 }
  0xa8   :  { %v278_v60 = vsel %vm277_vm1, %v274_v24, %v276_v57  ;;  %v281_v61 = vsel %vm277_vm1, %v276_v57, %v270_v25  ;;  %v214_v62 = vsel %vm211_vm3, %v204_v58, %v206_v50  ;;  %v1228_v24 = vrot.slane %v1184_v48, %v218_v36 }
  0xa9   :  { %v300_v5 = vmul.f32 %v1192_v54, %v278_v60  ;;  %v301_v8 = vmul.f32 %v1195_v55, %v281_v61  ;;  %v232_v9 = vmul.f32 %v1198_v56, %v214_v62  ;;  %v1231_v25 = vrot.slane %v1186_v49, %v218_v36 }
  0xaa   :  { %v1268_v60 = vrot.slane %v1130_v12, %v119_v47 }
  0xab   :  { %v243_v14 = vpop.permute.xlu0 %242  ;;  %360 = vmatpush1.msra.mxu0 %v232_v9  ;;  %426 = vmatprep.subr.mxu1 %v301_v8  ;;  %v171_v15 = vpop.permute.xlu1 %170  ;;  %v1273_v8 = vrot.slane %v1184_v48, %v185_v63 }
  0xac   :  { %v245_v16 = vsel %vm244_vm2, %v241_v32, %v243_v14  ;;  %v248_v18 = vsel %vm244_vm2, %v243_v14, %v237_v40  ;;  %427 = vmatpush1.msra.mxu1 %v300_v5  ;;  %361 = vmatprep.subr.mxu0 %v1039_v0  ;;  %v1241_v32 = vrot.slane %v1132_v13, %v185_v63 }
  0xad   :  { %v267_v22 = vmul.f32 %v1201_v59, %v245_v16  ;;  %v268_v23 = vmul.f32 %v1214_v10, %v248_v18  ;;  %362 = vmatpush1.msra.mxu0 %v1044_v1  ;;  %v1277_v14 = vrot.slane %v1186_v49, %v185_v63  ;;  %v86_v16 = vsub.s32 0, %v1124_v7 }
  0xaf   :  { %v173_v26 = vpop.permute.xlu0 %172  ;;  %428 = vmatprep.subr.mxu1 %v268_v23  ;;  %v210_v27 = vpop.permute.xlu1 %209 }
  0xb0   :  { %v181_v28 = vsel %vm178_vm4, %v171_v15, %v173_v26  ;;  %v212_v29 = vsel %vm211_vm3, %v208_v51, %v210_v27  ;;  %v215_v31 = vsel %vm211_vm3, %v210_v27, %v204_v58  ;;  %429 = vmatpush1.msra.mxu1 %v267_v22 }
  0xb1   :  { %v200_v33 = vmul.f32 %v1222_v19, %v181_v28  ;;  %v234_v34 = vmul.f32 %v1228_v24, %v212_v29  ;;  %v235_v36 = vmul.f32 %v1231_v25, %v215_v31  ;;  %v1294_v31 = vrot.slane %v1130_v12, %v86_v16 }
  0xb3   :  { %v177_v40 = vpop.permute.xlu0 %176  ;;  %363 = vmatprep.subr.mxu0 %v200_v33  ;;  %430 = vmatprep.subr.mxu1 %v235_v36  ;;  %v138_v41 = vpop.permute.xlu1 %137 }
  0xb4   :  { %v182_v42 = vsel %vm178_vm4, %v177_v40, %v171_v15  ;;  %431 = vmatpush1.msra.mxu1 %v234_v34  ;;  %v1280_v15 = vrot.slane %v1132_v13, %v119_v47 }
  0xb5   :  { %v199_v43 = vmul.f32 %v1241_v32, %v182_v42  ;;  %432 = vmatprep.subr.mxu1 %v1070_v3  ;;  %v1306_v42 = vrot.slane %v1132_v13, %v86_v16 }
  0xb6   :  { %433 = vmatpush1.msra.mxu1 %v1053_v2 }
  0xb7   :  { %v140_v50 = vpop.permute.xlu0 %139  ;;  %364 = vmatpush1.msra.mxu0 %v199_v43  ;;  %v144_v51 = vpop.permute.xlu1 %143 }
  0xb8   :  { %v148_v52 = vsel %vm145_vm5, %v138_v41, %v140_v50  ;;  %v149_v53 = vsel %vm145_vm5, %v144_v51, %v138_v41  ;;  %v1303_v41 = vrot.slane %v1186_v49, %v152_v39 }
  0xb9   :  { %v167_v57 = vmul.f32 %v1252_v44, %v148_v52  ;;  %v166_v58 = vmul.f32 %v1255_v45, %v149_v53 }
  0xbb   :  { %v105_v61 = vpop.permute.xlu0 %104  ;;  %365 = vmatprep.subr.mxu0 %v167_v57  ;;  %v107_v62 = vpop.permute.xlu1 %106 }
  0xbc   :  { %v115_v5 = vsel %vm112_vm6, %v105_v61, %v107_v62  ;;  %366 = vmatpush1.msra.mxu0 %v166_v58  ;;  %v1315_v58 = vrot.slane %v1184_v48, %v119_v47 }
  0xbd   :  { %v134_v9 = vmul.f32 %v1268_v60, %v115_v5  ;;  %v1321_v5 = vrot.slane %v1186_v49, %v119_v47 }
  0xbf   :  { %v175_v18 = vpop.permute.xlu0 %174  ;;  %367 = vmatprep.subr.mxu0 %v134_v9  ;;  %v111_v22 = vpop.permute.xlu1 %110  ;;  %v68_v9 = vld [vmem:[#allocation5] sm:$0xff] }
  0xc0   :  { %v179_v23 = vsel %vm178_vm4, %v175_v18, %v177_v40  ;;  %v180_v27 = vsel %vm178_vm4, %v173_v26, %v175_v18  ;;  %v116_v28 = vsel %vm112_vm6, %v111_v22, %v105_v61  ;;  %v1300_v40 = vrot.slane %v1184_v48, %v152_v39 }
  0xc1   :  { %v201_v63 = vmul.f32 %v1273_v8, %v180_v27  ;;  %v202_v29 = vmul.f32 %v1277_v14, %v179_v23  ;;  %v133_v7 = vmul.f32 %v1280_v15, %v116_v28  ;;  %v1331_v28 = vrot.slane %v1184_v48, %v86_v16 }
  0xc3   :  { %v70_v33 = vpop.permute.xlu0 %69  ;;  %368 = vmatpush1.msra.mxu0 %v133_v7  ;;  %434 = vmatprep.subr.mxu1 %v202_v29  ;;  %v72_v34 = vpop.permute.xlu1 %71 }
  0xc4   :  { %v82_v26 = vsel %vm79_vm7, %v70_v33, %v72_v34  ;;  %435 = vmatpush1.msra.mxu1 %v201_v63 }
  0xc5   :  { %v101_v36 = vmul.f32 %v1294_v31, %v82_v26 }
  0xc7   :  { %v142_v12 = vpop.permute.xlu0 %141  ;;  %369 = vmatprep.subr.mxu0 %v101_v36  ;;  %v76_v43 = vpop.permute.xlu1 %75 }
  0xc8   :  { %v146_v52 = vsel %vm145_vm5, %v142_v12, %v144_v51  ;;  %v147_v53 = vsel %vm145_vm5, %v140_v50, %v142_v12  ;;  %v83_v57 = vsel %vm79_vm7, %v76_v43, %v70_v33  ;;  %v1324_v50 = vrot.slane %v1186_v49, %v86_v16 }
  0xc9   :  { %v168_v39 = vmul.f32 %v1300_v40, %v147_v53  ;;  %v169_v13 = vmul.f32 %v1303_v41, %v146_v52  ;;  %v100_v61 = vmul.f32 %v1306_v42, %v83_v57 }
  0xcb   :  { %v109_v51 = vpop.permute.xlu0 %108  ;;  %370 = vmatpush1.msra.mxu0 %v100_v61  ;;  %436 = vmatprep.subr.mxu1 %v169_v13  ;;  %v74_v18 = vpop.permute.xlu1 %73  ;;  %v983_v61 = vmov 0  }
  0xcc   :  { %v113_v23 = vsel %vm112_vm6, %v109_v51, %v111_v22  ;;  %v114_v27 = vsel %vm112_vm6, %v107_v62, %v109_v51  ;;  %v80_v47 = vsel %vm79_vm7, %v74_v18, %v76_v43  ;;  %437 = vmatpush1.msra.mxu1 %v168_v39  ;;  %v81_v49 = vsel %vm79_vm7, %v72_v34, %v74_v18 }
  0xcd   :  { %v135_v63 = vmul.f32 %v1315_v58, %v114_v27  ;;  %v136_v29 = vmul.f32 %v1321_v5, %v113_v23  ;;  %879 = vmatmul.mubr.msk.f32.vlgmr.msra.gmra.mxu0 %vm335_vm8, %v68_v9  ;;  %v103_v62 = vmul.f32 %v1324_v50, %v80_v47  ;;  %v102_v48 = vmul.f32 %v1331_v28, %v81_v49 }
  0xce   :  { %725 = vmatprep.mubr.f32.mxu0 %v981_v4  ;;  %898 = vset.pattern.permute.xlu0 %v983_v61 }
  0xcf   :  { %438 = vmatprep.subr.mxu1 %v136_v29  ;;  %899 = vset.pattern.permute.xlu1 %v983_v61  ;;  %v500_v29 = vld [vmem:[%s1544_s3] sm:$0xff] }
  0xd0   :  { %439 = vmatpush1.msra.mxu1 %v135_v63 }
  0xd1   :  { %440 = vmatprep.subr.mxu1 %v103_v62 }
  0xd2   :  { %441 = vmatpush1.msra.mxu1 %v102_v48  ;;  %v504_v48 = vld [vmem:[%s1545_s4] sm:$0xff] }
  0xd3   :  { %880 = vmatmul.mubr.msk.f32.vlgmr.msra.gmra.mxu1 %vm335_vm8, %v68_v9 }
  0xd4   :  { %796 = vmatprep.mubr.f32.mxu1 %v981_v4 }
 0x18d   :  { %v405_v16 = vpop.f32.mrf.mxu0 }
 0x18e   :  { %v481_v7 = vmul.f32 %v405_v16, %v405_v16 }
 0x18f   :  { %v407_v22 = vpop.f32.mrf.mxu0 }
 0x190   :  { %v482_v33 = vmul.f32 %v407_v22, %v407_v22  ;;  %v485_v34 = vadd.f32 %v407_v22, %v405_v16 }
 0x192   :  { %v490_v43 = vadd.f32 %v482_v33, %v481_v7 }
 0x193   :  { %v476_v26 = vpop.f32.mrf.mxu1 }
 0x194   :  { %v483_v36 = vmul.f32 %v476_v26, %v476_v26  ;;  %v486_v12 = vadd.f32 %v485_v34, %v476_v26 }
 0x195   :  { %v478_v52 = vpop.f32.mrf.mxu1 }
 0x196   :  { %v487_v53 = vadd.f32 %v486_v12, %v478_v52  ;;  %v484_v57 = vmul.f32 %v478_v52, %v478_v52  ;;  %v491_v39 = vadd.f32 %v490_v43, %v483_v36 }
 0x198   :  { %488 = vadd.xlane.f32.xlu0 %v487_v53  ;;  %v492_v13 = vadd.f32 %v491_v39, %v484_v57 }
 0x19a   :  { %493 = vadd.xlane.f32.xlu1 %v492_v13 }
 0x221   :  { %v489_v4 = vpop.xlane.xlu0 %488 }
 0x222   :  { %v495_v9 = vmul.f32 0.001953125, %v489_v4 }
 0x223   :  { %v494_v51 = vpop.xlane.xlu1 %493 }
 0x224   :  { %v497_v18 = vmul.f32 %v495_v9, %v495_v9  ;;  %v496_v23 = vmul.f32 0.001953125, %v494_v51 }
 0x226   :  { %v498_v27 = vsub.f32 %v496_v23, %v497_v18 }
 0x228   :  { %v499_v47 = vmax.f32 %v498_v27, 0.0 }
 0x22a   :  { %v501_v63 = vadd.f32 1e-05, %v499_v47 }
 0x22c   :  { %900 = vrsqrt.f32 %v501_v63 }
 0x239   :  { %v901_v49 = vpop.eup %900 }
 0x23a   :  { %v503_v62 = vmul.f32 %v901_v49, %v500_v29 }
 0x23c   :  { %509 = vperm.xlu0 %898, %v503_v62   ;;  %v505_v7 = vmul.f32 %v503_v62, %v495_v9 }
 0x23e   :  { %v506_v33 = vsub.f32 %v504_v48, %v505_v7 }
 0x240   :  { %518 = vperm.xlu1 %899, %v506_v33  }
 0x2b7   :  { %v510_v34 = vpop.permute.xlu0 %509 }
 0x2b8   :  { %v513_v36 = vmul.f32 %v510_v34, %v407_v22  ;;  %v514_v43 = vmul.f32 %v510_v34, %v476_v26  ;;  %v515_v53 = vmul.f32 %v510_v34, %v478_v52  ;;  %v512_v4 = vmul.f32 %v510_v34, %v405_v16 }
 0x2bb   :  { %v519_v12 = vpop.permute.xlu1 %518 }
 0x2bc   :  { %v522_v57 = vadd.f32 %v519_v12, %v513_v36  ;;  %v523_v39 = vadd.f32 %v519_v12, %v514_v43  ;;  %v524_v13 = vadd.f32 %v519_v12, %v515_v53  ;;  %v521_v9 = vadd.f32 %v519_v12, %v512_v4 }
 0x2be   :  { %v1351_v61 = vmax.f32 %v522_v57, 0.0  ;;  %v1357_v51 = vmax.f32 %v523_v39, 0.0  ;;  %v1359_v18 = vmax.f32 %v524_v13, 0.0  ;;  %v1365_v22 = vmax.f32 %v521_v9, 0.0 }
 0x2c0   :  { %612 = vrot.lane.b32.xlu0 %v1351_v61, %s976_s23  ;;  %644 = vrot.lane.b32.xlu1 %v1351_v61, %s974_s20 }
 0x2c4   :  { %648 = vrot.lane.b32.xlu0 %v1359_v18, %s974_s20  ;;  %646 = vrot.lane.b32.xlu1 %v1357_v51, %s974_s20 }
 0x2c8   :  { %596 = vrot.lane.b32.xlu0 %v1351_v61, %s977_s26  ;;  %642 = vrot.lane.b32.xlu1 %v1365_v22, %s974_s20 }
 0x2cc   :  { %632 = vrot.lane.b32.xlu0 %v1359_v18, %s975_s22  ;;  %628 = vrot.lane.b32.xlu1 %v1351_v61, %s975_s22 }
 0x2d0   :  { %616 = vrot.lane.b32.xlu0 %v1359_v18, %s976_s23  ;;  %630 = vrot.lane.b32.xlu1 %v1357_v51, %s975_s22 }
 0x2d4   :  { %580 = vrot.lane.b32.xlu0 %v1351_v61, %s978_s0  ;;  %626 = vrot.lane.b32.xlu1 %v1365_v22, %s975_s22 }
 0x2d8   :  { %584 = vrot.lane.b32.xlu0 %v1359_v18, %s978_s0  ;;  %614 = vrot.lane.b32.xlu1 %v1357_v51, %s976_s23 }
 0x2dc   :  { %564 = vrot.lane.b32.xlu0 %v1351_v61, %s979_s27  ;;  %610 = vrot.lane.b32.xlu1 %v1365_v22, %s976_s23 }
 0x2e0   :  { %546 = vrot.lane.b32.xlu0 %v1365_v22, %s980_s28  ;;  %598 = vrot.lane.b32.xlu1 %v1357_v51, %s977_s26 }
 0x2e4   :  { %582 = vrot.lane.b32.xlu0 %v1357_v51, %s978_s0  ;;  %594 = vrot.lane.b32.xlu1 %v1365_v22, %s977_s26 }
 0x2e8   :  { %530 = vrot.lane.b32.xlu0 %v1365_v22, %s982_s29  ;;  %578 = vrot.lane.b32.xlu1 %v1365_v22, %s978_s0 }
 0x2ec   :  { %566 = vrot.lane.b32.xlu0 %v1357_v51, %s979_s27  ;;  %600 = vrot.lane.b32.xlu1 %v1359_v18, %s977_s26 }
 0x2f0   :  { %550 = vrot.lane.b32.xlu0 %v1357_v51, %s980_s28  ;;  %562 = vrot.lane.b32.xlu1 %v1365_v22, %s979_s27 }
 0x2f4   :  { %568 = vrot.lane.b32.xlu1 %v1359_v18, %s979_s27 }
 0x2f8   :  { %548 = vrot.lane.b32.xlu1 %v1351_v61, %s980_s28 }
 0x2fc   :  { %552 = vrot.lane.b32.xlu1 %v1359_v18, %s980_s28 }
 0x300   :  { %532 = vrot.lane.b32.xlu1 %v1351_v61, %s982_s29 }
 0x304   :  { %536 = vrot.lane.b32.xlu1 %v1359_v18, %s982_s29 }
 0x308   :  { %534 = vrot.lane.b32.xlu1 %v1357_v51, %s982_s29 }
 0x332   :  { %v613_v16 = vpop.permute.xlu0 %612  ;;  %v645_v26 = vpop.permute.xlu1 %644 }
 0x336   :  { %v649_v52 = vpop.permute.xlu0 %648  ;;  %v647_v23 = vpop.permute.xlu1 %646 }
 0x337   :  { %v651_v27 = vsel %vm310_vm0, %v645_v26, %v647_v23  ;;  %v650_v63 = vsel %vm310_vm0, %v647_v23, %v649_v52 }
 0x338   :  { %v655_v47 = vmul.f32 %v1128_v11, %v651_v27  ;;  %v656_v34 = vmul.f32 %v1169_v38, %v650_v63 }
 0x33a   :  { %v597_v29 = vpop.permute.xlu0 %596  ;;  %675 = vmatprep.subr.mxu0 %v655_v47  ;;  %v643_v49 = vpop.permute.xlu1 %642 }
 0x33b   :  { %v652_v62 = vsel %vm310_vm0, %v643_v49, %v645_v26  ;;  %v653_v48 = vsel %vm310_vm0, %v649_v52, %v643_v49 }
 0x33c   :  { %v654_v7 = vmul.f32 %v1136_v17, %v652_v62  ;;  %v657_v33 = vmul.f32 %v1167_v37, %v653_v48 }
 0x33e   :  { %v633_v36 = vpop.permute.xlu0 %632  ;;  %676 = vmatpush1.msra.mxu0 %v654_v7  ;;  %746 = vmatprep.subr.mxu1 %v657_v33  ;;  %v629_v11 = vpop.permute.xlu1 %628 }
 0x33f   :  { %747 = vmatpush1.msra.mxu1 %v656_v34 }
 0x342   :  { %v617_v12 = vpop.permute.xlu0 %616  ;;  %v631_v43 = vpop.permute.xlu1 %630 }
 0x343   :  { %v635_v53 = vsel %vm277_vm1, %v629_v11, %v631_v43  ;;  %v634_v39 = vsel %vm277_vm1, %v631_v43, %v633_v36 }
 0x344   :  { %v639_v57 = vmul.f32 %v635_v53, %v1143_v20  ;;  %v640_v26 = vmul.f32 %v634_v39, %v1192_v54 }
 0x346   :  { %v581_v17 = vpop.permute.xlu0 %580  ;;  %677 = vmatprep.subr.mxu0 %v639_v57  ;;  %v627_v37 = vpop.permute.xlu1 %626 }
 0x347   :  { %v636_v38 = vsel %vm277_vm1, %v627_v37, %v629_v11  ;;  %v637_v13 = vsel %vm277_vm1, %v633_v36, %v627_v37 }
 0x348   :  { %v638_v4 = vmul.f32 %v636_v38, %v1146_v21  ;;  %v641_v9 = vmul.f32 %v637_v13, %v1195_v55 }
 0x34a   :  { %v585_v52 = vpop.permute.xlu0 %584  ;;  %678 = vmatpush1.msra.mxu0 %v638_v4  ;;  %748 = vmatprep.subr.mxu1 %v641_v9  ;;  %v615_v20 = vpop.permute.xlu1 %614 }
 0x34b   :  { %v619_v23 = vsel %vm244_vm2, %v613_v16, %v615_v20  ;;  %749 = vmatpush1.msra.mxu1 %v640_v26  ;;  %v618_v47 = vsel %vm244_vm2, %v615_v20, %v617_v12 }
 0x34c   :  { %v623_v27 = vmul.f32 %v619_v23, %v1158_v30  ;;  %v624_v48 = vmul.f32 %v618_v47, %v1201_v59 }
 0x34e   :  { %v565_v63 = vpop.permute.xlu0 %564  ;;  %679 = vmatprep.subr.mxu0 %v623_v27  ;;  %v611_v21 = vpop.permute.xlu1 %610 }
 0x34f   :  { %v620_v55 = vsel %vm244_vm2, %v611_v21, %v613_v16  ;;  %v621_v54 = vsel %vm244_vm2, %v617_v12, %v611_v21 }
 0x350   :  { %v622_v49 = vmul.f32 %v620_v55, %v1164_v35  ;;  %v625_v62 = vmul.f32 %v621_v54, %v1214_v10 }
 0x352   :  { %v547_v7 = vpop.permute.xlu0 %546  ;;  %680 = vmatpush1.msra.mxu0 %v622_v49  ;;  %750 = vmatprep.subr.mxu1 %v625_v62  ;;  %v599_v30 = vpop.permute.xlu1 %598 }
 0x353   :  { %v603_v33 = vsel %vm211_vm3, %v597_v29, %v599_v30  ;;  %751 = vmatpush1.msra.mxu1 %v624_v48 }
 0x354   :  { %v607_v34 = vmul.f32 %v603_v33, %v1181_v46 }
 0x356   :  { %681 = vmatprep.subr.mxu0 %v607_v34  ;;  %v595_v16 = vpop.permute.xlu1 %594  ;;  %v583_v36 = vpop.permute.xlu0 %582 }
 0x357   :  { %v604_v35 = vsel %vm211_vm3, %v595_v16, %v597_v29 }
 0x358   :  { %v606_v10 = vmul.f32 %v604_v35, %v1198_v56 }
 0x35a   :  { %682 = vmatpush1.msra.mxu0 %v606_v10  ;;  %v579_v59 = vpop.permute.xlu1 %578  ;;  %v531_v53 = vpop.permute.xlu0 %530 }
 0x35b   :  { %v588_v11 = vsel %vm178_vm4, %v579_v59, %v581_v17  ;;  %v589_v12 = vsel %vm178_vm4, %v585_v52, %v579_v59  ;;  %683 = vmatprep.subr.mxu0 %v1351_v61 }
 0x35c   :  { %v590_v46 = vmul.f32 %v589_v12, %v1241_v32  ;;  %v591_v43 = vmul.f32 %v588_v11, %v1222_v19  ;;  %684 = vmatpush1.msra.mxu0 %v1365_v22  ;;  %v586_v32 = vsel %vm178_vm4, %v583_v36, %v585_v52  ;;  %v587_v19 = vsel %vm178_vm4, %v581_v17, %v583_v36 }
 0x35d   :  { %v593_v13 = vmul.f32 %v586_v32, %v1277_v14  ;;  %v822_v32 = vld [vmem:[%s1547_s6] sm:$0xff]  ;;  %s984_s6 = smov [#allocation7]  }
 0x35e   :  { %685 = vmatprep.subr.mxu0 %v591_v43  ;;  %v601_v29 = vpop.permute.xlu1 %600  ;;  %v567_v37 = vpop.permute.xlu0 %566  ;;  %s865_s15 = sshll.u32 %s984_s6, 4  ;;  %s866_s15 = int_to_ptr.vmem [resolvable:$true] %s865_s15 }
 0x35f   :  { %v602_v56 = vsel %vm211_vm3, %v599_v30, %v601_v29  ;;  %v605_v57 = vsel %vm211_vm3, %v601_v29, %v595_v16  ;;  %686 = vmatpush1.msra.mxu0 %v590_v46  ;;  %p949_p11 = scmp.lt.s32.totalorder %s866_s15, %s866_s15 }
 0x360   :  { %v608_v39 = vmul.f32 %v602_v56, %v1228_v24  ;;  %v609_v61 = vmul.f32 %v605_v57, %v1231_v25  ;;  %v592_v24 = vmul.f32 %v587_v19, %v1273_v8  ;;  %v571_v25 = vsel %vm145_vm5, %v565_v63, %v567_v37 }
 0x361   :  { %v576_v8 = vmul.f32 %v571_v25, %v1300_v40 }
 0x362   :  { %752 = vmatprep.subr.mxu1 %v609_v61  ;;  %v563_v22 = vpop.permute.xlu1 %562  ;;  %v551_v20 = vpop.permute.xlu0 %550 }
 0x363   :  { %v572_v38 = vsel %vm145_vm5, %v563_v22, %v565_v63  ;;  %753 = vmatpush1.msra.mxu1 %v608_v39 }
 0x364   :  { %v575_v4 = vmul.f32 %v572_v38, %v1252_v44  ;;  %754 = vmatprep.subr.mxu1 %v1359_v18 }
 0x365   :  { %755 = vmatpush1.msra.mxu1 %v1357_v51 }
 0x366   :  { %687 = vmatprep.subr.mxu0 %v575_v4  ;;  %756 = vmatprep.subr.mxu1 %v593_v13  ;;  %v569_v17 = vpop.permute.xlu1 %568 }
 0x367   :  { %v570_v9 = vsel %vm145_vm5, %v567_v37, %v569_v17  ;;  %v573_v14 = vsel %vm145_vm5, %v569_v17, %v563_v22  ;;  %757 = vmatpush1.msra.mxu1 %v592_v24  ;;  %v826_v37 = vld [vmem:[%s1548_s7] sm:$0xff]  ;;  %s944_s7 = scalar_lea.vmem %s866_s15, 512 }
 0x368   :  { %v574_v44 = vmul.f32 %v573_v14, %v1255_v45  ;;  %v577_v18 = vmul.f32 %v570_v9, %v1303_v41  ;;  %p945_p10 = scmp.ne.s32.totalorder %s866_s15, %s944_s7  ;;  %p950_p12 = scmp.lt.s32.totalorder %s944_s7, %s944_s7 }
 0x36a   :  { %688 = vmatpush1.msra.mxu0 %v574_v44  ;;  %758 = vmatprep.subr.mxu1 %v577_v18  ;;  %v549_v51 = vpop.permute.xlu1 %548  ;;  %p951_p13 = por %p950_p12, %p949_p11 }
 0x36b   :  { %v556_v26 = vsel %vm112_vm6, %v547_v7, %v549_v51  ;;  %759 = vmatpush1.msra.mxu1 %v576_v8  ;;  %v555_v23 = vsel %vm112_vm6, %v549_v51, %v551_v20 }
 0x36c   :  { %v559_v52 = vmul.f32 %v556_v26, %v1268_v60  ;;  %v560_v63 = vmul.f32 %v555_v23, %v1315_v58  ;;  %v529_v58 = vld [vmem:[%s1546_s5] sm:$0xff]  ;;  %p952_p0 = pnand %p951_p13, %p945_p10 }
 0x36e   :  { %689 = vmatprep.subr.mxu0 %v559_v52  ;;  %v553_v27 = vpop.permute.xlu1 %552 }
 0x36f   :  { %v554_v45 = vsel %vm112_vm6, %v551_v20, %v553_v27  ;;  %v557_v40 = vsel %vm112_vm6, %v553_v27, %v547_v7 }
 0x370   :  { %v558_v41 = vmul.f32 %v557_v40, %v1280_v15  ;;  %v561_v47 = vmul.f32 %v554_v45, %v1321_v5 }
 0x372   :  { %690 = vmatpush1.msra.mxu0 %v558_v41  ;;  %760 = vmatprep.subr.mxu1 %v561_v47  ;;  %v533_v60 = vpop.permute.xlu1 %532 }
 0x373   :  { %v540_v21 = vsel %vm79_vm7, %v531_v53, %v533_v60  ;;  %761 = vmatpush1.msra.mxu1 %v560_v63 }
 0x374   :  { %v543_v55 = vmul.f32 %v540_v21, %v1294_v31 }
 0x376   :  { %691 = vmatprep.subr.mxu0 %v543_v55  ;;  %v537_v54 = vpop.permute.xlu1 %536 }
 0x377   :  { %v541_v49 = vsel %vm79_vm7, %v537_v54, %v531_v53 }
 0x378   :  { %v542_v15 = vmul.f32 %v541_v49, %v1306_v42 }
 0x37a   :  { %692 = vmatpush1.msra.mxu0 %v542_v15  ;;  %v535_v5 = vpop.permute.xlu1 %534 }
 0x37b   :  { %v538_v62 = vsel %vm79_vm7, %v535_v5, %v537_v54  ;;  %v539_v48 = vsel %vm79_vm7, %v533_v60, %v535_v5  ;;  %881 = vmatmul.mubr.msk.f32.vlgmr.msra.gmra.mxu0 %vm335_vm8, %v529_v58 }
 0x37c   :  { %v544_v31 = vmul.f32 %v539_v48, %v1331_v28  ;;  %v545_v7 = vmul.f32 %v538_v62, %v1324_v50 }
 0x37e   :  { %762 = vmatprep.subr.mxu1 %v545_v7 }
 0x37f   :  { %763 = vmatpush1.msra.mxu1 %v544_v31 }
 0x380   :  { %882 = vmatmul.mubr.msk.f32.vlgmr.msra.gmra.mxu1 %vm335_vm8, %v529_v58 }
 0x43b   :  { %v727_v42 = vpop.f32.mrf.mxu0 }
 0x43c   :  { %v803_v30 = vmul.f32 %v727_v42, %v727_v42 }
 0x43d   :  { %v729_v33 = vpop.f32.mrf.mxu0 }
 0x43e   :  { %v804_v34 = vmul.f32 %v729_v33, %v729_v33  ;;  %v807_v16 = vadd.f32 %v729_v33, %v727_v42 }
 0x440   :  { %v812_v36 = vadd.f32 %v804_v34, %v803_v30  ;;  %v798_v35 = vpop.f32.mrf.mxu1 }
 0x441   :  { %v805_v10 = vmul.f32 %v798_v35, %v798_v35  ;;  %v808_v6 = vadd.f32 %v807_v16, %v798_v35 }
 0x442   :  { %v800_v59 = vpop.f32.mrf.mxu1 }
 0x443   :  { %v806_v11 = vmul.f32 %v800_v59, %v800_v59  ;;  %v809_v12 = vadd.f32 %v808_v6, %v800_v59  ;;  %v813_v46 = vadd.f32 %v812_v36, %v805_v10 }
 0x445   :  { %810 = vadd.xlane.f32.xlu0 %v809_v12  ;;  %v814_v28 = vadd.f32 %v813_v46, %v806_v11 }
 0x447   :  { %815 = vadd.xlane.f32.xlu1 %v814_v28 }
 0x4ce   :  { %v811_v50 = vpop.xlane.xlu0 %810 }
 0x4cf   :  { %v817_v43 = vmul.f32 0.001953125, %v811_v50 }
 0x4d0   :  { %v816_v53 = vpop.xlane.xlu1 %815 }
 0x4d1   :  { %v819_v29 = vmul.f32 %v817_v43, %v817_v43  ;;  %v818_v56 = vmul.f32 0.001953125, %v816_v53 }
 0x4d3   :  { %v820_v57 = vsub.f32 %v818_v56, %v819_v29 }
 0x4d5   :  { %v821_v39 = vmax.f32 %v820_v57, 0.0 }
 0x4d7   :  { %v823_v61 = vadd.f32 1e-05, %v821_v39 }
 0x4d9   :  { %902 = vrsqrt.f32 %v823_v61 }
 0x4e6   :  { %v903_v19 = vpop.eup %902 }
 0x4e7   :  { %v825_v22 = vmul.f32 %v903_v19, %v822_v32 }
 0x4e9   :  { %831 = vperm.xlu0 %898, %v825_v22   ;;  %v827_v38 = vmul.f32 %v825_v22, %v817_v43 }
 0x4eb   :  { %v828_v13 = vsub.f32 %v826_v37, %v827_v38 }
 0x4ed   :  { %840 = vperm.xlu1 %899, %v828_v13  }
 0x564   :  { %v832_v4 = vpop.permute.xlu0 %831 }
 0x565   :  { %v834_v24 = vmul.f32 %v832_v4, %v727_v42  ;;  %v835_v25 = vmul.f32 %v832_v4, %v729_v33  ;;  %v836_v17 = vmul.f32 %v832_v4, %v798_v35  ;;  %v837_v9 = vmul.f32 %v832_v4, %v800_v59 }
 0x568   :  { %v841_v14 = vpop.permute.xlu1 %840 }
 0x569   :  { %v843_v44 = vadd.f32 %v841_v14, %v834_v24  ;;  %v844_v18 = vadd.f32 %v841_v14, %v835_v25  ;;  %v845_v8 = vadd.f32 %v841_v14, %v836_v17  ;;  %v846_v51 = vadd.f32 %v841_v14, %v837_v9 }
 0x56b   :  { %v847_v26 = vadd.f32 %v843_v44, %v1044_v1  ;;  %v848_v52 = vadd.f32 %v844_v18, %v1039_v0  ;;  %v849_v20 = vadd.f32 %v845_v8, %v1053_v2  ;;  %v850_v23 = vadd.f32 %v846_v51, %v1070_v3 }
 0x56d   :  { %v851_v27 = vmax.f32 %v847_v26, 0.0  ;;  %v852_v45 = vmax.f32 %v848_v52, 0.0  ;;  %v853_v40 = vmax.f32 %v849_v20, 0.0  ;;  %v854_v41 = vmax.f32 %v850_v23, 0.0 }
 0x56f   :  { %855 = vst [vmem:[#allocation7] sm:$0xff] %v851_v27  ;;  %856 = vst [vmem:[#allocation7 + $0x8] sm:$0xff] %v852_v45 }
 0x570   :  { %857 = vst [vmem:[#allocation7 + $0x10] sm:$0xff] %v853_v40  ;;  %858 = vst [vmem:[#allocation7 + $0x18] sm:$0xff] %v854_v41 }
 0x571   :  { %955 = shalt.err (!%p952_p0)
}
 0x572   :  { %868 = dma.vmem_to_hbm [thread:$0]  %s866_s15, 512, %s1549_s8, [#allocation4]  }
 0x573   :  { %968 = dma.done.wait [#allocation4], 512  }
 0x574   :  { %969 = vsyncadd [#allocation4], 4294966784 }
 0x575   :  { %872 = vsyncpa [#allocation3], 1 }
 0x576   :  { %873 = vsyncpa [#allocation6], 1 }
 0x577   :  { %874 = vsyncpa [#allocation4], 1 }

</bundles_post_ra>
